<compile_context>
chip_gen: v7x
topology: tpu7x:2x2x1
jax: 0.10.0
libtpu: 0.0.40
codegen_flags: <defaults>
</compile_context>

<pallas_src>
import jax
import jax.numpy as jnp
from jax.experimental import pallas as pl
from jax.experimental.pallas import tpu as pltpu


def _round_up(x, m):
    return ((x + m - 1) // m) * m


def latent_variable_kernel(ann_ref, laug_ref, epsT_ref, out_ref):
    """out[:, b] = tril(L_{ann[b]}) @ eps[:, b] + mu_{ann[b]}   (lane axis = batch).

    ann_ref  : [1, TB]    int32   annotator id per batch column
    laug_ref : [A, D, Dp] float32 [tril(L_a) | mu_a | 0-pad]  (all annotators)
    epsT_ref : [Dp, TB]   float32 [eps^T ; ones ; 0-pad]
    out_ref  : [D, TB]    float32 z^T tile
    """
    ann = ann_ref[...]                          # [1, TB]
    x = epsT_ref[...]                           # [Dp, TB]
    num_annotators = laug_ref.shape[0]

    acc = jnp.zeros(out_ref.shape, jnp.float32)
    # A is small (number of annotators); unrolled at trace time. Each step is
    # one MXU matmul [D, Dp] @ [Dp, TB] plus a lane-masked select.
    for a in range(num_annotators):
        la = laug_ref[a]                        # [D, Dp] (static index)
        y = jnp.dot(la, x, preferred_element_type=jnp.float32)   # [D, TB]
        acc = jnp.where(ann == a, y, acc)
    out_ref[...] = acc


def latent_variable_forward(posterior_mu, posterior_covtril, annotator, eps,
                            sample=True, block_b=512):
    """Pallas-backed forward of LatentVariable.

    posterior_mu      : [A, D]    float32
    posterior_covtril : [A, D, D] float32 (un-masked; tril applied here)
    annotator         : [B]       int    (annotator index per batch element)
    eps               : [B, D]    float32 standard-normal noise
    returns z         : [B, D]    float32
    """
    A, D = posterior_mu.shape
    B = annotator.shape[0]
    ann = annotator.astype(jnp.int32)
    mu = posterior_mu.astype(jnp.float32)

    if not sample:
        # dist.loc path: z = mu[annotator] exactly -- no kernel, no noise DMA.
        return jnp.take(mu, ann, axis=0)

    # --- parameter prep (on the tiny [A, ...] tensors, once) -----------------
    L_tril = jnp.tril(posterior_covtril.astype(jnp.float32))      # [A, D, D]
    Dp = _round_up(D + 1, 8)                                      # MXU-friendly K
    laug = jnp.concatenate(
        [L_tril, mu[:, :, None],
         jnp.zeros((A, D, Dp - D - 1), jnp.float32)], axis=2)     # [A, D, Dp]

    # --- lane-dense activations: batch on the lane axis ----------------------
    epsT = eps.astype(jnp.float32).T                              # [D, B]
    epsT_aug = jnp.concatenate(
        [epsT, jnp.ones((1, B), jnp.float32),
         jnp.zeros((Dp - D - 1, B), jnp.float32)], axis=0)        # [Dp, B]

    # --- batch tiling ---------------------------------------------------------
    if B <= block_b:
        tb = B                                  # single tile == full dim (ok)
        b_pad = B
    else:
        tb = block_b                            # multiple of 128
        b_pad = pl.cdiv(B, tb) * tb
    if b_pad != B:
        pad = b_pad - B
        epsT_aug = jnp.pad(epsT_aug, ((0, 0), (0, pad)))
        ann = jnp.pad(ann, (0, pad))            # padded cols use annotator 0; sliced off
    ann2d = ann.reshape(1, b_pad)

    num_tiles = b_pad // tb
    cost = pl.CostEstimate(
        flops=2 * A * D * Dp * b_pad,
        transcendentals=0,
        bytes_accessed=4 * (num_tiles * A * D * Dp + (Dp + D) * b_pad + b_pad),
    )

    z_t = pl.pallas_call(
        latent_variable_kernel,
        out_shape=jax.ShapeDtypeStruct((D, b_pad), jnp.float32),
        grid=(num_tiles,),
        in_specs=[
            pl.BlockSpec((1, tb), lambda i: (0, i)),          # annotator ids
            pl.BlockSpec((A, D, Dp), lambda i: (0, 0, 0)),    # all L|mu (resident)
            pl.BlockSpec((Dp, tb), lambda i: (0, i)),         # eps^T tile
        ],
        out_specs=pl.BlockSpec((D, tb), lambda i: (0, i)),
        compiler_params=pltpu.CompilerParams(
            dimension_semantics=("parallel",),
            vmem_limit_bytes=16 * 1024 * 1024,
        ),
        cost_estimate=cost,
    )(ann2d, laug, epsT_aug)

    return z_t[:, :B].T                         # back to [B, D]


def init_latent_variable_params(key, num_annotators, latent_dims,
                                prior_mu_value=0.0, prior_sigma_value=1.0,
                                z_posterior_init_sigma=0.1):
    """Re-implementation of LatentVariable.__init__ parameter init."""
    a, d = num_annotators, latent_dims
    prior_mu = jnp.full((a, d), prior_mu_value, dtype=jnp.float32)
    prior_covtril = jnp.tile(jnp.eye(d, dtype=jnp.float32) * prior_sigma_value,
                             (a, 1, 1))
    post_mu = (jax.random.normal(key, (a, d), dtype=jnp.float32)
               * z_posterior_init_sigma + prior_mu_value)
    post_covtril = jnp.tile(jnp.eye(d, dtype=jnp.float32) * prior_sigma_value,
                            (a, 1, 1))
    return prior_mu, prior_covtril, post_mu, post_covtril
    # TODO(synk): get_kl_loss (MVN KL divergence) not implemented; only forward().


def _reference(posterior_mu, posterior_covtril, annotator, eps):
    mu_sel = posterior_mu[annotator]
    l_sel = jnp.tril(posterior_covtril[annotator])
    return mu_sel + jnp.einsum("bij,bj->bi", l_sel, eps)


if __name__ == "__main__":
    key = jax.random.PRNGKey(0)
    k1, k2, k3, k4, k5, k6 = jax.random.split(key, 6)

    num_annotators = 4
    latent_dims = 8
    batch = 16

    # Use a dense (non-triangular) covtril so the tril semantics are exercised.
    posterior_mu = 0.1 * jax.random.normal(k1, (num_annotators, latent_dims),
                                           jnp.float32)
    posterior_covtril = (jnp.eye(latent_dims, dtype=jnp.float32)[None]
                         + 0.1 * jax.random.normal(
                             k2, (num_annotators, latent_dims, latent_dims),
                             jnp.float32))
    annotator = jax.random.randint(k3, (batch,), 0, num_annotators,
                                   dtype=jnp.int32)
    eps = jax.random.normal(k4, (batch, latent_dims), jnp.float32)

    z = jax.block_until_ready(
        latent_variable_forward(posterior_mu, posterior_covtril, annotator,
                                eps, sample=True))
    z_ref = _reference(posterior_mu, posterior_covtril, annotator, eps)
    assert z.shape == (batch, latent_dims)
    assert jnp.allclose(z, z_ref, atol=1e-5), "mismatch vs reference (sample)"

    # sample=False path returns the gathered means exactly.
    z_det = jax.block_until_ready(
        latent_variable_forward(posterior_mu, posterior_covtril, annotator,
                                eps, sample=False))
    assert jnp.allclose(z_det, posterior_mu[annotator], atol=1e-6)

    # Multi-tile + padded-batch path (exercises grid pipelining & padding).
    batch2 = 272
    annotator2 = jax.random.randint(k5, (batch2,), 0, num_annotators,
                                    dtype=jnp.int32)
    eps2 = jax.random.normal(k6, (batch2, latent_dims), jnp.float32)
    z2 = jax.block_until_ready(
        latent_variable_forward(posterior_mu, posterior_covtril, annotator2,
                                eps2, sample=True, block_b=128))
    z2_ref = _reference(posterior_mu, posterior_covtril, annotator2, eps2)
    assert jnp.allclose(z2, z2_ref, atol=1e-5), "mismatch vs reference (tiled)"

    print("KERNEL_OK")
</pallas_src>

<mosaic_0001>
module attributes {stable_mosaic.version = 11 : i64} {
  func.func @latent_variable_kernel(%arg0: i32, %arg1: memref<1x16xi32, #tpu.memory_space<vmem>>, %arg2: memref<4x8x16xf32, #tpu.memory_space<vmem>>, %arg3: memref<16x16xf32, #tpu.memory_space<vmem>>, %arg4: memref<8x16xf32, #tpu.memory_space<vmem>>) attributes {dimension_semantics = [#tpu.dimension_semantics<parallel>], iteration_bounds = array<i64: 1>, scalar_prefetch = 0 : i64, scratch_operands = 0 : i64, tpu.core_type = #tpu.core_type<tc>, window_params = [{transform_indices = @transform_0, window_bounds = array<i64: 1, 16>}, {pipeline_mode = #tpu.pipeline_mode<synchronous>, transform_indices = @transform_1, window_bounds = array<i64: 4, 8, 16>}, {transform_indices = @transform_2, window_bounds = array<i64: 16, 16>}, {transform_indices = @transform_3, window_bounds = array<i64: 8, 16>}]} {
    %c0 = arith.constant 0 : index
    %c0_0 = arith.constant 0 : index
    %0 = vector.load %arg1[%c0, %c0_0] : memref<1x16xi32, #tpu.memory_space<vmem>>, vector<1x16xi32>
    %c0_1 = arith.constant 0 : index
    %c0_2 = arith.constant 0 : index
    %1 = vector.load %arg3[%c0_1, %c0_2] : memref<16x16xf32, #tpu.memory_space<vmem>>, vector<16x16xf32>
    %cst = arith.constant 0.000000e+00 : f32
    %2 = vector.broadcast %cst : f32 to vector<8x16xf32>
    %c0_3 = arith.constant 0 : index
    %c0_4 = arith.constant 0 : index
    %c0_5 = arith.constant 0 : index
    %3 = vector.load %arg2[%c0_3, %c0_4, %c0_5] : memref<4x8x16xf32, #tpu.memory_space<vmem>>, vector<1x8x16xf32>
    %4 = vector.shape_cast %3 : vector<1x8x16xf32> to vector<8x16xf32>
    %cst_6 = arith.constant dense<0.000000e+00> : vector<8x16xf32>
    %5 = tpu.matmul %4, %1, %cst_6 {dimension_numbers = #tpu.dot_dimension_numbers<[1], [0], [0], [1], [0, 0, 1, 1], [], []>} : vector<8x16xf32>, vector<16x16xf32>, vector<8x16xf32> -> vector<8x16xf32>
    %c0_i32 = arith.constant 0 : i32
    %6 = vector.broadcast %c0_i32 : i32 to vector<1x16xi32>
    %7 = arith.cmpi eq, %0, %6 : vector<1x16xi32>
    %8 = vector.shape_cast %7 : vector<1x16xi1> to vector<1x16xi1>
    %9 = vector.broadcast %8 : vector<1x16xi1> to vector<8x16xi1>
    %10 = arith.select %9, %5, %2 : vector<8x16xi1>, vector<8x16xf32>
    %c1 = arith.constant 1 : index
    %c0_7 = arith.constant 0 : index
    %c0_8 = arith.constant 0 : index
    %11 = vector.load %arg2[%c1, %c0_7, %c0_8] : memref<4x8x16xf32, #tpu.memory_space<vmem>>, vector<1x8x16xf32>
    %12 = vector.shape_cast %11 : vector<1x8x16xf32> to vector<8x16xf32>
    %cst_9 = arith.constant dense<0.000000e+00> : vector<8x16xf32>
    %13 = tpu.matmul %12, %1, %cst_9 {dimension_numbers = #tpu.dot_dimension_numbers<[1], [0], [0], [1], [0, 0, 1, 1], [], []>} : vector<8x16xf32>, vector<16x16xf32>, vector<8x16xf32> -> vector<8x16xf32>
    %c1_i32 = arith.constant 1 : i32
    %14 = vector.broadcast %c1_i32 : i32 to vector<1x16xi32>
    %15 = arith.cmpi eq, %0, %14 : vector<1x16xi32>
    %16 = vector.shape_cast %15 : vector<1x16xi1> to vector<1x16xi1>
    %17 = vector.broadcast %16 : vector<1x16xi1> to vector<8x16xi1>
    %18 = arith.select %17, %13, %10 : vector<8x16xi1>, vector<8x16xf32>
    %c2 = arith.constant 2 : index
    %c0_10 = arith.constant 0 : index
    %c0_11 = arith.constant 0 : index
    %19 = vector.load %arg2[%c2, %c0_10, %c0_11] : memref<4x8x16xf32, #tpu.memory_space<vmem>>, vector<1x8x16xf32>
    %20 = vector.shape_cast %19 : vector<1x8x16xf32> to vector<8x16xf32>
    %cst_12 = arith.constant dense<0.000000e+00> : vector<8x16xf32>
    %21 = tpu.matmul %20, %1, %cst_12 {dimension_numbers = #tpu.dot_dimension_numbers<[1], [0], [0], [1], [0, 0, 1, 1], [], []>} : vector<8x16xf32>, vector<16x16xf32>, vector<8x16xf32> -> vector<8x16xf32>
    %c2_i32 = arith.constant 2 : i32
    %22 = vector.broadcast %c2_i32 : i32 to vector<1x16xi32>
    %23 = arith.cmpi eq, %0, %22 : vector<1x16xi32>
    %24 = vector.shape_cast %23 : vector<1x16xi1> to vector<1x16xi1>
    %25 = vector.broadcast %24 : vector<1x16xi1> to vector<8x16xi1>
    %26 = arith.select %25, %21, %18 : vector<8x16xi1>, vector<8x16xf32>
    %c3 = arith.constant 3 : index
    %c0_13 = arith.constant 0 : index
    %c0_14 = arith.constant 0 : index
    %27 = vector.load %arg2[%c3, %c0_13, %c0_14] : memref<4x8x16xf32, #tpu.memory_space<vmem>>, vector<1x8x16xf32>
    %28 = vector.shape_cast %27 : vector<1x8x16xf32> to vector<8x16xf32>
    %cst_15 = arith.constant dense<0.000000e+00> : vector<8x16xf32>
    %29 = tpu.matmul %28, %1, %cst_15 {dimension_numbers = #tpu.dot_dimension_numbers<[1], [0], [0], [1], [0, 0, 1, 1], [], []>} : vector<8x16xf32>, vector<16x16xf32>, vector<8x16xf32> -> vector<8x16xf32>
    %c3_i32 = arith.constant 3 : i32
    %30 = vector.broadcast %c3_i32 : i32 to vector<1x16xi32>
    %31 = arith.cmpi eq, %0, %30 : vector<1x16xi32>
    %32 = vector.shape_cast %31 : vector<1x16xi1> to vector<1x16xi1>
    %33 = vector.broadcast %32 : vector<1x16xi1> to vector<8x16xi1>
    %34 = arith.select %33, %29, %26 : vector<8x16xi1>, vector<8x16xf32>
    %c0_16 = arith.constant 0 : index
    %c0_17 = arith.constant 0 : index
    %35 = vector.load %arg4[%c0_16, %c0_17] : memref<8x16xf32, #tpu.memory_space<vmem>>, vector<8x16xf32>
    tpu.vector_store %arg4[%c0_16, %c0_17], %34 {strides = array<i32>} : memref<8x16xf32, #tpu.memory_space<vmem>>, vector<8x16xf32>,
    return
  }
  func.func @transform_0(%arg0: i32) -> (i32, i32) {
    %c0_i32 = arith.constant 0 : i32
    %c0_i32_0 = arith.constant 0 : i32
    return %c0_i32, %arg0 : i32, i32
  }
  func.func @transform_1(%arg0: i32) -> (i32, i32, i32) {
    %c0_i32 = arith.constant 0 : i32
    %c0_i32_0 = arith.constant 0 : i32
    %c0_i32_1 = arith.constant 0 : i32
    %c0_i32_2 = arith.constant 0 : i32
    return %c0_i32, %c0_i32_0, %c0_i32_1 : i32, i32, i32
  }
  func.func @transform_2(%arg0: i32) -> (i32, i32) {
    %c0_i32 = arith.constant 0 : i32
    %c0_i32_0 = arith.constant 0 : i32
    return %c0_i32, %arg0 : i32, i32
  }
  func.func @transform_3(%arg0: i32) -> (i32, i32) {
    %c0_i32 = arith.constant 0 : i32
    %c0_i32_0 = arith.constant 0 : i32
    return %c0_i32, %arg0 : i32, i32
  }
}

</mosaic_0001>

<bundles_post_ra>
// kernel: tpu_custom_call.1
= control target key start
LH: loop header
LB: loop body
LE: loop exit
PB: predicated region body
PF: predicated region fallthrough
CT: control target
= control target key end

     0   :  { %8 = vsyncpa [#allocation3], 0  ;;  %s659_s0 = inlined_call_operand.hbm [shape: s32[1,16], index: 0, kind: input, shape index: {}]   ;;  %s660_s1 = inlined_call_operand.hbm [shape: f32[4,8,16], index: 1, kind: input, shape index: {}]   ;;  %s661_s2 = inlined_call_operand.hbm [shape: f32[16,16], index: 2, kind: input, shape index: {}]   ;;  %s662_s3 = inlined_call_operand.hbm [shape: f32[8,16], index: 3, kind: output, shape index: {}]  }
   0x1   :  { %9 = vsyncpa [#allocation6], 0 }
   0x2   :  { %10 = vsyncpa [#allocation4], 0  ;;  %s566_s12 = smov [#allocation5]   ;;  %s472_s16 = scalar_lea.hbm %s660_s1, 512 }
   0x3   :  { %s26_s13 = sshll.u32 %s566_s12, 4  ;;  %p473_p0 = scmp.ne.s32.totalorder %s660_s1, %s472_s16  ;;  %s27_s13 = int_to_ptr.vmem [resolvable:$true] %s26_s13 }
   0x4   :  { %p476_p1 = scmp.lt.u32.totalorder %s472_s16, %s660_s1 }
   0x6   :  { %p478_p2 = pnand %p476_p1, %p473_p0 }
   0x8   :  { %481 = shalt.err (!%p478_p2)
}
   0x9   :  { %s482_s21 = scalar_lea.vmem %s27_s13, 512  ;;  %p487_p4 = scmp.lt.s32.totalorder %s27_s13, %s27_s13 }
   0xa   :  { %p483_p3 = scmp.ne.s32.totalorder %s27_s13, %s482_s21  ;;  %p488_p5 = scmp.lt.s32.totalorder %s482_s21, %s482_s21 }
   0xc   :  { %p489_p6 = por %p488_p5, %p487_p4 }
   0xe   :  { %p490_p7 = pnand %p489_p6, %p483_p3 }
  0x10   :  { %493 = shalt.err (!%p490_p7)
}
  0x11   :  { %s567_s22 = smov 128   ;;  %s568_s23 = smov 8  }
  0x12   :  { %32 = dma.hbm_to_vmem [thread:$0]  %s660_s1, 512, %s27_s13, [#allocation6], %s567_s22, %s567_s22, %s568_s23  }
  0x13   :  { %s569_s26 = smov [#allocation2]   ;;  %s570_s28 = smov [#allocation7]  }
  0x14   :  { %s17_s27 = sshll.u32 %s569_s26, 4  ;;  %s38_s29 = sshll.u32 %s570_s28, 4  ;;  %s18_s27 = int_to_ptr.vmem [resolvable:$true] %s17_s27  ;;  %s39_s29 = int_to_ptr.vmem [resolvable:$true] %s38_s29 }
  0x15   :  { %s494_s5 = scalar_lea.hbm %s659_s0, 16 }
  0x16   :  { %p495_p8 = scmp.ne.s32.totalorder %s659_s0, %s494_s5  ;;  %p498_p9 = scmp.lt.u32.totalorder %s494_s5, %s659_s0 }
  0x18   :  { %p500_p10 = pnand %p498_p9, %p495_p8 }
  0x1a   :  { %503 = shalt.err (!%p500_p10)
}
  0x1b   :  { %s504_s1 = scalar_lea.vmem %s18_s27, 16  ;;  %s508_s10 = scalar_lea.vmem %s18_s27, 32 }
  0x1c   :  { %p505_p11 = scmp.ne.s32.totalorder %s18_s27, %s504_s1  ;;  %p509_p12 = scmp.lt.s32.totalorder %s18_s27, %s18_s27 }
  0x1d   :  { %p510_p13 = scmp.lt.s32.totalorder %s508_s10, %s504_s1 }
  0x1f   :  { %p511_p0 = por %p510_p13, %p509_p12 }
  0x21   :  { %p512_p1 = pnand %p511_p0, %p505_p11 }
  0x23   :  { %515 = shalt.err (!%p512_p1)
}
  0x24   :  { %20 = dma.hbm_to_vmem [thread:$0]  %s659_s0, 16, %s18_s27, [#allocation3]  }
  0x25   :  { %s516_s15 = scalar_lea.hbm %s661_s2, 256 }
  0x26   :  { %p517_p2 = scmp.ne.s32.totalorder %s661_s2, %s516_s15  ;;  %p520_p3 = scmp.lt.u32.totalorder %s516_s15, %s661_s2 }
  0x28   :  { %p522_p4 = pnand %p520_p3, %p517_p2 }
  0x2a   :  { %525 = shalt.err (!%p522_p4)
}
  0x2b   :  { %s526_s20 = scalar_lea.vmem %s39_s29, 256  ;;  %p531_p6 = scmp.lt.s32.totalorder %s39_s29, %s39_s29 }
  0x2c   :  { %p527_p5 = scmp.ne.s32.totalorder %s39_s29, %s526_s20  ;;  %p532_p7 = scmp.lt.s32.totalorder %s526_s20, %s526_s20 }
  0x2e   :  { %p533_p8 = por %p532_p7, %p531_p6 }
  0x30   :  { %p534_p9 = pnand %p533_p8, %p527_p5 }
  0x32   :  { %537 = shalt.err (!%p534_p9)
}
  0x33   :  { %44 = dma.hbm_to_vmem [thread:$0]  %s661_s2, 256, %s39_s29, [#allocation6], %s567_s22, %s567_s22, %s568_s23  }
  0x34   :  { %560 = dma.done.wait [#allocation3], 16  }
  0x35   :  { %561 = vsyncadd [#allocation3], 4294967280 }
  0x36   :  { %562 = dma.done.wait [#allocation6], 768  }
  0x37   :  { %563 = vsyncadd [#allocation6], 4294966528  ;;  %v571_v0 = vmov 0.0|0.0   ;;  %vm572_vm0 = vmmov 0   ;;  %v573_v1 = vmov 0.0   ;;  %v55_v2 = vld [vmem:[#allocation7] sm:$0xff]  ;;  %v134_v9 = vlaneseq }
  0x38   :  { %450 = vmatprep.subr.bf16.mxu0 %v571_v0  ;;  %453 = vmatprep.subr.bf16.mxu1 %v571_v0  ;;  %v56_v3 = vld [vmem:[#allocation7 + $0x8] sm:$0xff]  ;;  %v57_v5 = vld [vmem:[#allocation5] sm:$0xff]  ;;  %vm58_vm1 = vcmask 130048   ;;  %v224_v7 = vld [vmem:[#allocation5 + $0x10] sm:$0xff]  ;;  %v574_v13 = vmov 0   ;;  %s575_s2 = smov [#allocation8]  }
  0x39   :  { %426 = vmatprep.mubr.msk.f32.mxu0 %vm572_vm0, %v573_v1  ;;  %433 = vmatprep.mubr.msk.f32.mxu1 %vm572_vm0, %v573_v1  ;;  %v451_v4 = vpack.c.bf16 %v56_v3, %v55_v2  ;;  %v141_v6 = vld [vmem:[#allocation5 + $0x8] sm:$0xff]  ;;  %v307_v8 = vld [vmem:[#allocation5 + $0x18] sm:$0xff]  ;;  %v135_v11 = vshrl.u32 %v134_v9, 7  ;;  %s396_s22 = sshll.u32 %s575_s2, 4  ;;  %s397_s22 = int_to_ptr.vmem [resolvable:$true] %s396_s22 }
  0x3a   :  { %v54_v10 = vld [vmem:[#allocation2] sm:$0x1]  ;;  %s538_s23 = scalar_lea.vmem %s397_s22, 128  ;;  %p543_p11 = scmp.lt.s32.totalorder %s397_s22, %s397_s22 }
  0x3b   :  { %452 = vmatpush3.bf16.msra.mxu0 %v451_v4  ;;  %455 = vmatpush3.bf16.msra.mxu1 %v451_v4  ;;  %vm132_vm2 = vcmp.eq.s32.totalorder %v54_v10, 0  ;;  %vm215_vm3 = vcmp.eq.s32.totalorder %v54_v10, 1  ;;  %v136_v12 = vsub.s32 0, %v135_v11  ;;  %vm298_vm4 = vcmp.eq.s32.totalorder %v54_v10, 2  ;;  %p539_p10 = scmp.ne.s32.totalorder %s397_s22, %s538_s23  ;;  %p544_p12 = scmp.lt.s32.totalorder %s538_s23, %s538_s23 }
  0x3c   :  { %456 = vmatprep.subr.bf16.mxu0 %v571_v0  ;;  %459 = vmatprep.subr.bf16.mxu1 %v571_v0  ;;  %v133_v14 = vsel %vm132_vm2, 1, %v574_v13  ;;  %v216_v15 = vsel %vm215_vm3, 1, %v574_v13  ;;  %vm381_vm5 = vcmp.eq.s32.totalorder %v54_v10, 3  ;;  %v299_v18 = vsel %vm298_vm4, 1, %v574_v13 }
  0x3d   :  { %v137_v16 = vrot.slane %v133_v14, %v136_v12  ;;  %v220_v17 = vrot.slane %v216_v15, %v136_v12  ;;  %v382_v19 = vsel %vm381_vm5, 1, %v574_v13  ;;  %v303_v20 = vrot.slane %v299_v18, %v136_v12  ;;  %p545_p13 = por %p544_p12, %p543_p11 }
  0x3e   :  { %427 = vmatmul.mubr.msk.f32.vlgmr.msra.gmra.mrb[0].mxu0 %vm58_vm1, %v57_v5  ;;  %434 = vmatmul.mubr.msk.f32.vlgmr.msra.gmra.mrb[0].mxu1 %vm58_vm1, %v141_v6  ;;  %v386_v21 = vrot.slane %v382_v19, %v136_v12 }
  0x3f   :  { %458 = vmatpush3.bf16.msra.mxu0 %v451_v4  ;;  %461 = vmatpush3.bf16.msra.mxu1 %v451_v4  ;;  %vm138_vm6 = vcmp.eq.s32.totalorder %v137_v16, 1  ;;  %vm221_vm7 = vcmp.eq.s32.totalorder %v220_v17, 1  ;;  %vm304_vm8 = vcmp.eq.s32.totalorder %v303_v20, 1  ;;  %p546_p0 = pnand %p545_p13, %p539_p10 }
  0x40   :  { %440 = vmatprep.mubr.msk.f32.mxu0 %vm572_vm0, %v573_v1  ;;  %447 = vmatprep.mubr.msk.f32.mxu1 %vm572_vm0, %v573_v1  ;;  %vm387_vm9 = vcmp.eq.s32.totalorder %v386_v21, 1 }
  0x42   :  { %441 = vmatmul.mubr.msk.f32.vlgmr.msra.gmra.mrb[2].mxu0 %vm58_vm1, %v224_v7  ;;  %448 = vmatmul.mubr.msk.f32.vlgmr.msra.gmra.mrb[2].mxu1 %vm58_vm1, %v307_v8 }
 0x111   :  { %v128_v22 = vpop.f32.mrb[0].mxu0  ;;  %v211_v23 = vpop.f32.mrb[0].mxu1 }
 0x112   :  { %v139_v24 = vsel %vm138_vm6, %v128_v22, 0.0  ;;  %v428_v25 = vpop.f32.mrb[1].mxu0  ;;  %v435_v26 = vpop.f32.mrb[1].mxu1 }
 0x113   :  { %v222_v27 = vsel %vm221_vm7, %v211_v23, %v139_v24 }
 0x115   :  { %v294_v28 = vpop.f32.mrb[2].mxu0  ;;  %v377_v29 = vpop.f32.mrb[2].mxu1 }
 0x116   :  { %v305_v30 = vsel %vm304_vm8, %v294_v28, %v222_v27  ;;  %v442_v31 = vpop.f32.mrb[3].mxu0  ;;  %v449_v32 = vpop.f32.mrb[3].mxu1 }
 0x117   :  { %v388_v33 = vsel %vm387_vm9, %v377_v29, %v305_v30 }
 0x118   :  { %389 = vst.msk [vmem:[#allocation8] sm:$0xff] %vm58_vm1, %v388_v33 }
 0x119   :  { %549 = shalt.err (!%p546_p0)
}
 0x11a   :  { %s550_s26 = scalar_lea.hbm %s662_s3, 128 }
 0x11b   :  { %p551_p1 = scmp.ne.s32.totalorder %s662_s3, %s550_s26  ;;  %p554_p2 = scmp.lt.u32.totalorder %s550_s26, %s662_s3 }
 0x11d   :  { %p556_p3 = pnand %p554_p2, %p551_p1 }
 0x11f   :  { %559 = shalt.err (!%p556_p3)
}
 0x120   :  { %399 = dma.vmem_to_hbm [thread:$0]  %s397_s22, 128, %s662_s3, [#allocation4]  }
 0x121   :  { %564 = dma.done.wait [#allocation4], 128  }
 0x122   :  { %565 = vsyncadd [#allocation4], 4294967168 }
 0x123   :  { %403 = vsyncpa [#allocation3], 1 }
 0x124   :  { %404 = vsyncpa [#allocation6], 1 }
 0x125   :  { %405 = vsyncpa [#allocation4], 1 }

</bundles_post_ra>
